<compile_context>
chip_gen: v6e
topology: v6e:2x2x1
jax: 0.10.0
libtpu: 0.0.40
codegen_flags: <defaults>
</compile_context>

<pallas_src>
import math

import jax
import jax.numpy as jnp
from jax import lax
from jax.experimental import pallas as pl
from jax.experimental.pallas import tpu as pltpu  # noqa: F401  (TPU backend assumed)

# ----------------------------- config (small) --------------------------------
BATCH = 2
SEQ = 8            # window_size
EMBED = 32         # embed_dim
HEADS = 4          # attention_head_size
HEAD_DIM = EMBED // HEADS
INTER = 4 * EMBED  # FeedForward intermediate_size (= 128)
LN_EPS = 1e-5


def _erf_approx(z):
    # Abramowitz & Stegun 7.1.26 rational approximation, |err| < 1.5e-7
    # (matches exact-erf GELU to float32 precision inside the kernel).
    az = jnp.abs(z)
    t = 1.0 / (1.0 + 0.3275911 * az)
    poly = ((((1.061405429 * t - 1.453152027) * t + 1.421413741) * t
             - 0.284496736) * t + 0.254829592) * t
    y = 1.0 - poly * jnp.exp(-az * az)
    return jnp.where(z >= 0, y, -y)


def _layer_norm(h, g, b):
    mu = jnp.mean(h, axis=-1, keepdims=True)
    var = jnp.mean((h - mu) ** 2, axis=-1, keepdims=True)
    return (h - mu) * lax.rsqrt(var + LN_EPS) * g + b


# ------------------------------- Pallas kernel --------------------------------
def transformer_block_kernel(x_ref, wqkv_ref, wo_ref, w1_ref, w2_ref, vecs_ref, o_ref):
    BT = BATCH * SEQ
    x = x_ref[...]                                     # (B*T, D)

    # Unpack the lane-dense (4, 128) small-parameter block.
    vecs = vecs_ref[...]
    g1, be1 = vecs[0:1, 0:EMBED], vecs[0:1, EMBED:2 * EMBED]
    g2, be2 = vecs[0:1, 2 * EMBED:3 * EMBED], vecs[0:1, 3 * EMBED:4 * EMBED]
    bqkv = vecs[1:2, 0:3 * EMBED]                      # (1, 96)  = [bq | bk | bv]
    bo = vecs[2:3, 0:EMBED]
    b2 = vecs[2:3, EMBED:2 * EMBED]
    b1 = vecs[3:4, :]                                  # (1, 128)

    # ---- sub-block 1: x = x + MHA(LN1(x)) ------------------------------------
    h = _layer_norm(x, g1, be1)
    qkv = jnp.dot(h, wqkv_ref[...],
                  preferred_element_type=jnp.float32) + bqkv          # (B*T, 96)

    row = lax.broadcasted_iota(jnp.int32, (SEQ, SEQ), 0)
    col = lax.broadcasted_iota(jnp.int32, (SEQ, SEQ), 1)
    causal = (col <= row)[None, :, :]                  # (1, T, T), broadcast over batch

    scale = 1.0 / math.sqrt(HEAD_DIM)
    wo = wo_ref[...]
    proj = None
    for hd in range(HEADS):                            # small static loop over heads
        q_h = qkv[:, hd * HEAD_DIM:(hd + 1) * HEAD_DIM].reshape(BATCH, SEQ, HEAD_DIM)
        k_h = qkv[:, EMBED + hd * HEAD_DIM:EMBED + (hd + 1) * HEAD_DIM
                  ].reshape(BATCH, SEQ, HEAD_DIM)
        v_h = qkv[:, 2 * EMBED + hd * HEAD_DIM:2 * EMBED + (hd + 1) * HEAD_DIM
                  ].reshape(BATCH, SEQ, HEAD_DIM)
        s = jnp.einsum('bqd,bkd->bqk', q_h, k_h,
                       preferred_element_type=jnp.float32) * scale    # (B, T, T)
        s = jnp.where(causal, s, -1e30)
        s = s - jnp.max(s, axis=-1, keepdims=True)     # keep max-sub before exp
        p = jnp.exp(s)
        p = p * pl.reciprocal(jnp.sum(p, axis=-1, keepdims=True), approx=True)
        o_h = jnp.einsum('bqk,bkd->bqd', p, v_h,
                         preferred_element_type=jnp.float32)          # (B, T, Hd)
        o_h = o_h.reshape(BT, HEAD_DIM)
        # attn @ Wo == sum_h o_h @ Wo[rows_h]  -> no concatenate, accumulate here.
        contrib = jnp.dot(o_h, wo[hd * HEAD_DIM:(hd + 1) * HEAD_DIM, :],
                          preferred_element_type=jnp.float32)
        proj = contrib if proj is None else proj + contrib
    x = x + proj + bo

    # ---- sub-block 2: x = x + FFN(LN2(x)) ------------------------------------
    h2 = _layer_norm(x, g2, be2)
    f = jnp.dot(h2, w1_ref[...], preferred_element_type=jnp.float32) + b1
    f = 0.5 * f * (1.0 + _erf_approx(f * 0.7071067811865476))          # exact GELU
    f = jnp.dot(f, w2_ref[...], preferred_element_type=jnp.float32) + b2
    # nn.Dropout has no effect in eval/inference mode -> identity here.
    o_ref[...] = x + f


# ------------------------------- wrapper --------------------------------------
@jax.jit
def transformer_block(x, params):
    B, T, D = x.shape
    # Fuse Q/K/V weights/biases and pack the small vectors (17 inputs -> 6).
    wqkv = jnp.concatenate([params["wq"], params["wk"], params["wv"]], axis=1)   # (32, 96)
    z32 = jnp.zeros((1, EMBED), jnp.float32)
    vecs = jnp.concatenate([
        jnp.concatenate([params["g1"], params["be1"], params["g2"], params["be2"]], axis=1),
        jnp.concatenate([params["bq"], params["bk"], params["bv"], z32], axis=1),
        jnp.concatenate([params["bo"], params["b2"], z32, z32], axis=1),
        params["b1"],
    ], axis=0)                                                                    # (4, 128)

    out = pl.pallas_call(
        transformer_block_kernel,
        out_shape=jax.ShapeDtypeStruct((B * T, D), x.dtype),
        # No grid: single invocation, full arrays as VMEM blocks (problem is tiny
        # and otherwise pure per-grid-step + DMA-descriptor overhead).
    )(x.reshape(B * T, D), wqkv, params["wo"], params["w1"], params["w2"], vecs)
    return out.reshape(B, T, D)


# ------------------------------ reference (plain JAX) -------------------------
def transformer_block_ref(x, p):
    B, T, D = x.shape
    h = _layer_norm(x, p["g1"], p["be1"])
    q = h @ p["wq"] + p["bq"]
    k = h @ p["wk"] + p["bk"]
    v = h @ p["wv"] + p["bv"]
    qh = q.reshape(B, T, HEADS, HEAD_DIM).transpose(0, 2, 1, 3)
    kh = k.reshape(B, T, HEADS, HEAD_DIM).transpose(0, 2, 1, 3)
    vh = v.reshape(B, T, HEADS, HEAD_DIM).transpose(0, 2, 1, 3)
    s = jnp.einsum("bhqd,bhkd->bhqk", qh, kh) / math.sqrt(HEAD_DIM)
    mask = jnp.tril(jnp.ones((T, T), bool))
    s = jnp.where(mask, s, -1e30)
    a = jax.nn.softmax(s, axis=-1)
    o = jnp.einsum("bhqk,bhkd->bhqd", a, vh).transpose(0, 2, 1, 3).reshape(B, T, D)
    o = o @ p["wo"] + p["bo"]
    x = x + o
    h2 = _layer_norm(x, p["g2"], p["be2"])
    f = jax.nn.gelu(h2 @ p["w1"] + p["b1"], approximate=False)
    f = f @ p["w2"] + p["b2"]
    return x + f


# ------------------------------ params / main ---------------------------------
def make_params(key):
    ks = jax.random.split(key, 16)
    n = lambda k, s, sc=0.02: sc * jax.random.normal(k, s, jnp.float32)
    return dict(
        g1=1.0 + n(ks[0], (1, EMBED)), be1=n(ks[1], (1, EMBED)),
        wq=n(ks[2], (EMBED, EMBED)),   bq=n(ks[3], (1, EMBED)),
        wk=n(ks[4], (EMBED, EMBED)),   bk=n(ks[5], (1, EMBED)),
        wv=n(ks[6], (EMBED, EMBED)),   bv=n(ks[7], (1, EMBED)),
        wo=n(ks[8], (EMBED, EMBED)),   bo=n(ks[9], (1, EMBED)),
        g2=1.0 + n(ks[10], (1, EMBED)), be2=n(ks[11], (1, EMBED)),
        w1=n(ks[12], (EMBED, INTER)),  b1=n(ks[13], (1, INTER)),
        w2=n(ks[14], (INTER, EMBED)),  b2=n(ks[15], (1, EMBED)),
    )


if __name__ == "__main__":
    key = jax.random.PRNGKey(0)
    kx, kp = jax.random.split(key)
    x = jax.random.normal(kx, (BATCH, SEQ, EMBED), jnp.float32)
    params = make_params(kp)

    out = jax.block_until_ready(transformer_block(x, params))
    ref = transformer_block_ref(x, params)
    assert out.shape == (BATCH, SEQ, EMBED)
    # 2e-4 tolerance: approx-reciprocal softmax + erf polynomial vs exact reference
    # (error budget analysis puts the actual deviation well below 1e-4).
    assert jnp.allclose(out, ref, atol=2e-4, rtol=2e-4), \
        f"max abs diff = {jnp.max(jnp.abs(out - ref))}"
    print("KERNEL_OK")
</pallas_src>

<mosaic_0001>
module attributes {stable_mosaic.version = 11 : i64} {
  func.func @transformer_block_kernel(%arg0: memref<16x32xf32, #tpu.memory_space<vmem>>, %arg1: memref<32x96xf32, #tpu.memory_space<vmem>>, %arg2: memref<32x32xf32, #tpu.memory_space<vmem>>, %arg3: memref<32x128xf32, #tpu.memory_space<vmem>>, %arg4: memref<128x32xf32, #tpu.memory_space<vmem>>, %arg5: memref<4x128xf32, #tpu.memory_space<vmem>>, %arg6: memref<16x32xf32, #tpu.memory_space<vmem>>) attributes {dimension_semantics = [], scalar_prefetch = 0 : i64, scratch_operands = 0 : i64, tpu.core_type = #tpu.core_type<tc>} {
    %c0 = arith.constant 0 : index
    %c0_0 = arith.constant 0 : index
    %0 = vector.load %arg0[%c0, %c0_0] : memref<16x32xf32, #tpu.memory_space<vmem>>, vector<16x32xf32>
    %c0_1 = arith.constant 0 : index
    %c0_2 = arith.constant 0 : index
    %1 = vector.load %arg5[%c0_1, %c0_2] : memref<4x128xf32, #tpu.memory_space<vmem>>, vector<4x128xf32>
    %2 = vector.extract_strided_slice %1 {offsets = [0, 0], sizes = [1, 32], strides = [1, 1]} : vector<4x128xf32> to vector<1x32xf32>
    %3 = vector.extract_strided_slice %1 {offsets = [0, 32], sizes = [1, 32], strides = [1, 1]} : vector<4x128xf32> to vector<1x32xf32>
    %4 = vector.extract_strided_slice %1 {offsets = [0, 64], sizes = [1, 32], strides = [1, 1]} : vector<4x128xf32> to vector<1x32xf32>
    %5 = vector.extract_strided_slice %1 {offsets = [0, 96], sizes = [1, 32], strides = [1, 1]} : vector<4x128xf32> to vector<1x32xf32>
    %6 = vector.extract_strided_slice %1 {offsets = [1, 0], sizes = [1, 96], strides = [1, 1]} : vector<4x128xf32> to vector<1x96xf32>
    %7 = vector.extract_strided_slice %1 {offsets = [2, 0], sizes = [1, 32], strides = [1, 1]} : vector<4x128xf32> to vector<1x32xf32>
    %8 = vector.extract_strided_slice %1 {offsets = [2, 32], sizes = [1, 32], strides = [1, 1]} : vector<4x128xf32> to vector<1x32xf32>
    %9 = vector.extract_strided_slice %1 {offsets = [3, 0], sizes = [1, 128], strides = [1, 1]} : vector<4x128xf32> to vector<1x128xf32>
    %cst = arith.constant dense<0.000000e+00> : vector<16xf32>
    %10 = vector.multi_reduction <add>, %0, %cst [1] : vector<16x32xf32> to vector<16xf32>
    %11 = vector.shape_cast %10 : vector<16xf32> to vector<16x1xf32>
    %cst_3 = arith.constant 3.200000e+01 : f32
    %12 = vector.broadcast %cst_3 : f32 to vector<16x1xf32>
    %13 = arith.divf %11, %12 : vector<16x1xf32>
    %14 = vector.broadcast %13 : vector<16x1xf32> to vector<16x32xf32>
    %15 = arith.subf %0, %14 : vector<16x32xf32>
    %16 = arith.mulf %15, %15 : vector<16x32xf32>
    %cst_4 = arith.constant dense<0.000000e+00> : vector<16xf32>
    %17 = vector.multi_reduction <add>, %16, %cst_4 [1] : vector<16x32xf32> to vector<16xf32>
    %18 = vector.shape_cast %17 : vector<16xf32> to vector<16x1xf32>
    %cst_5 = arith.constant 3.200000e+01 : f32
    %19 = vector.broadcast %cst_5 : f32 to vector<16x1xf32>
    %20 = arith.divf %18, %19 : vector<16x1xf32>
    %21 = vector.broadcast %13 : vector<16x1xf32> to vector<16x32xf32>
    %22 = arith.subf %0, %21 : vector<16x32xf32>
    %cst_6 = arith.constant 9.99999974E-6 : f32
    %23 = vector.broadcast %cst_6 : f32 to vector<16x1xf32>
    %24 = arith.addf %20, %23 : vector<16x1xf32>
    %25 = math.rsqrt %24 : vector<16x1xf32>
    %26 = vector.broadcast %25 : vector<16x1xf32> to vector<16x32xf32>
    %27 = arith.mulf %22, %26 : vector<16x32xf32>
    %28 = vector.broadcast %2 : vector<1x32xf32> to vector<16x32xf32>
    %29 = arith.mulf %27, %28 : vector<16x32xf32>
    %30 = vector.broadcast %3 : vector<1x32xf32> to vector<16x32xf32>
    %31 = arith.addf %29, %30 : vector<16x32xf32>
    %c0_7 = arith.constant 0 : index
    %c0_8 = arith.constant 0 : index
    %32 = vector.load %arg1[%c0_7, %c0_8] : memref<32x96xf32, #tpu.memory_space<vmem>>, vector<32x96xf32>
    %cst_9 = arith.constant dense<0.000000e+00> : vector<16x96xf32>
    %33 = tpu.matmul %31, %32, %cst_9 {dimension_numbers = #tpu.dot_dimension_numbers<[1], [0], [0], [1], [0, 0, 1, 1], [], []>} : vector<16x32xf32>, vector<32x96xf32>, vector<16x96xf32> -> vector<16x96xf32>
    %34 = vector.broadcast %6 : vector<1x96xf32> to vector<16x96xf32>
    %35 = arith.addf %33, %34 : vector<16x96xf32>
    %36 = tpu.iota {dimensions = array<i32: 0>} : vector<8x8xi32>
    %37 = tpu.iota {dimensions = array<i32: 1>} : vector<8x8xi32>
    %38 = arith.cmpi sle, %37, %36 : vector<8x8xi32>
    %39 = vector.shape_cast %38 : vector<8x8xi1> to vector<1x8x8xi1>
    %c0_10 = arith.constant 0 : index
    %c0_11 = arith.constant 0 : index
    %40 = vector.load %arg2[%c0_10, %c0_11] : memref<32x32xf32, #tpu.memory_space<vmem>>, vector<32x32xf32>
    %41 = vector.extract_strided_slice %35 {offsets = [0, 0], sizes = [16, 8], strides = [1, 1]} : vector<16x96xf32> to vector<16x8xf32>
    %42 = vector.shape_cast %41 : vector<16x8xf32> to vector<2x8x8xf32>
    %43 = vector.extract_strided_slice %35 {offsets = [0, 32], sizes = [16, 8], strides = [1, 1]} : vector<16x96xf32> to vector<16x8xf32>
    %44 = vector.shape_cast %43 : vector<16x8xf32> to vector<2x8x8xf32>
    %45 = vector.extract_strided_slice %35 {offsets = [0, 64], sizes = [16, 8], strides = [1, 1]} : vector<16x96xf32> to vector<16x8xf32>
    %46 = vector.shape_cast %45 : vector<16x8xf32> to vector<2x8x8xf32>
    "tpu.trace_start"() <{level = 10 : i32, message = "bqd,bkd->bqk"}> : () -> ()
    %cst_12 = arith.constant dense<0.000000e+00> : vector<2x8x8xf32>
    %47 = tpu.matmul %42, %44, %cst_12 {dimension_numbers = #tpu.dot_dimension_numbers<[2], [2], [1], [1], [0, 0, 0, 1, 1, 1], [0], [0]>} : vector<2x8x8xf32>, vector<2x8x8xf32>, vector<2x8x8xf32> -> vector<2x8x8xf32>
    "tpu.trace_stop"() : () -> ()
    %cst_13 = arith.constant 0.353553385 : f32
    %48 = vector.broadcast %cst_13 : f32 to vector<2x8x8xf32>
    %49 = arith.mulf %47, %48 : vector<2x8x8xf32>
    %cst_14 = arith.constant -1.000000e+30 : f32
    %50 = vector.shape_cast %39 : vector<1x8x8xi1> to vector<1x8x8xi1>
    %51 = vector.broadcast %50 : vector<1x8x8xi1> to vector<2x8x8xi1>
    %52 = vector.broadcast %cst_14 : f32 to vector<2x8x8xf32>
    %53 = arith.select %51, %49, %52 : vector<2x8x8xi1>, vector<2x8x8xf32>
    %cst_15 = arith.constant dense<0xFF800000> : vector<2x8xf32>
    %54 = vector.multi_reduction <maximumf>, %53, %cst_15 [2] : vector<2x8x8xf32> to vector<2x8xf32>
    %55 = vector.shape_cast %54 : vector<2x8xf32> to vector<2x8x1xf32>
    %56 = vector.broadcast %55 : vector<2x8x1xf32> to vector<2x8x8xf32>
    %57 = arith.subf %53, %56 : vector<2x8x8xf32>
    %58 = math.exp %57 : vector<2x8x8xf32>
    %cst_16 = arith.constant dense<0.000000e+00> : vector<2x8xf32>
    %59 = vector.multi_reduction <add>, %58, %cst_16 [2] : vector<2x8x8xf32> to vector<2x8xf32>
    %60 = vector.shape_cast %59 : vector<2x8xf32> to vector<2x8x1xf32>
    %61 = tpu.reciprocal %60 {approx = true} : vector<2x8x1xf32> -> vector<2x8x1xf32>
    %62 = vector.broadcast %61 : vector<2x8x1xf32> to vector<2x8x8xf32>
    %63 = arith.mulf %58, %62 : vector<2x8x8xf32>
    "tpu.trace_start"() <{level = 10 : i32, message = "bqk,bkd->bqd"}> : () -> ()
    %cst_17 = arith.constant dense<0.000000e+00> : vector<2x8x8xf32>
    %64 = tpu.matmul %63, %46, %cst_17 {dimension_numbers = #tpu.dot_dimension_numbers<[2], [1], [1], [2], [0, 0, 0, 1, 1, 2], [0], [0]>} : vector<2x8x8xf32>, vector<2x8x8xf32>, vector<2x8x8xf32> -> vector<2x8x8xf32>
    "tpu.trace_stop"() : () -> ()
    %65 = vector.shape_cast %64 : vector<2x8x8xf32> to vector<16x8xf32>
    %66 = vector.extract_strided_slice %40 {offsets = [0, 0], sizes = [8, 32], strides = [1, 1]} : vector<32x32xf32> to vector<8x32xf32>
    %cst_18 = arith.constant dense<0.000000e+00> : vector<16x32xf32>
    %67 = tpu.matmul %65, %66, %cst_18 {dimension_numbers = #tpu.dot_dimension_numbers<[1], [0], [0], [1], [0, 0, 1, 1], [], []>} : vector<16x8xf32>, vector<8x32xf32>, vector<16x32xf32> -> vector<16x32xf32>
    %68 = vector.extract_strided_slice %35 {offsets = [0, 8], sizes = [16, 8], strides = [1, 1]} : vector<16x96xf32> to vector<16x8xf32>
    %69 = vector.shape_cast %68 : vector<16x8xf32> to vector<2x8x8xf32>
    %70 = vector.extract_strided_slice %35 {offsets = [0, 40], sizes = [16, 8], strides = [1, 1]} : vector<16x96xf32> to vector<16x8xf32>
    %71 = vector.shape_cast %70 : vector<16x8xf32> to vector<2x8x8xf32>
    %72 = vector.extract_strided_slice %35 {offsets = [0, 72], sizes = [16, 8], strides = [1, 1]} : vector<16x96xf32> to vector<16x8xf32>
    %73 = vector.shape_cast %72 : vector<16x8xf32> to vector<2x8x8xf32>
    "tpu.trace_start"() <{level = 10 : i32, message = "bqd,bkd->bqk"}> : () -> ()
    %cst_19 = arith.constant dense<0.000000e+00> : vector<2x8x8xf32>
    %74 = tpu.matmul %69, %71, %cst_19 {dimension_numbers = #tpu.dot_dimension_numbers<[2], [2], [1], [1], [0, 0, 0, 1, 1, 1], [0], [0]>} : vector<2x8x8xf32>, vector<2x8x8xf32>, vector<2x8x8xf32> -> vector<2x8x8xf32>
    "tpu.trace_stop"() : () -> ()
    %cst_20 = arith.constant 0.353553385 : f32
    %75 = vector.broadcast %cst_20 : f32 to vector<2x8x8xf32>
    %76 = arith.mulf %74, %75 : vector<2x8x8xf32>
    %cst_21 = arith.constant -1.000000e+30 : f32
    %77 = vector.shape_cast %39 : vector<1x8x8xi1> to vector<1x8x8xi1>
    %78 = vector.broadcast %77 : vector<1x8x8xi1> to vector<2x8x8xi1>
    %79 = vector.broadcast %cst_21 : f32 to vector<2x8x8xf32>
    %80 = arith.select %78, %76, %79 : vector<2x8x8xi1>, vector<2x8x8xf32>
    %cst_22 = arith.constant dense<0xFF800000> : vector<2x8xf32>
    %81 = vector.multi_reduction <maximumf>, %80, %cst_22 [2] : vector<2x8x8xf32> to vector<2x8xf32>
    %82 = vector.shape_cast %81 : vector<2x8xf32> to vector<2x8x1xf32>
    %83 = vector.broadcast %82 : vector<2x8x1xf32> to vector<2x8x8xf32>
    %84 = arith.subf %80, %83 : vector<2x8x8xf32>
    %85 = math.exp %84 : vector<2x8x8xf32>
    %cst_23 = arith.constant dense<0.000000e+00> : vector<2x8xf32>
    %86 = vector.multi_reduction <add>, %85, %cst_23 [2] : vector<2x8x8xf32> to vector<2x8xf32>
    %87 = vector.shape_cast %86 : vector<2x8xf32> to vector<2x8x1xf32>
    %88 = tpu.reciprocal %87 {approx = true} : vector<2x8x1xf32> -> vector<2x8x1xf32>
    %89 = vector.broadcast %88 : vector<2x8x1xf32> to vector<2x8x8xf32>
    %90 = arith.mulf %85, %89 : vector<2x8x8xf32>
    "tpu.trace_start"() <{level = 10 : i32, message = "bqk,bkd->bqd"}> : () -> ()
    %cst_24 = arith.constant dense<0.000000e+00> : vector<2x8x8xf32>
    %91 = tpu.matmul %90, %73, %cst_24 {dimension_numbers = #tpu.dot_dimension_numbers<[2], [1], [1], [2], [0, 0, 0, 1, 1, 2], [0], [0]>} : vector<2x8x8xf32>, vector<2x8x8xf32>, vector<2x8x8xf32> -> vector<2x8x8xf32>
    "tpu.trace_stop"() : () -> ()
    %92 = vector.shape_cast %91 : vector<2x8x8xf32> to vector<16x8xf32>
    %93 = vector.extract_strided_slice %40 {offsets = [8, 0], sizes = [8, 32], strides = [1, 1]} : vector<32x32xf32> to vector<8x32xf32>
    %cst_25 = arith.constant dense<0.000000e+00> : vector<16x32xf32>
    %94 = tpu.matmul %92, %93, %cst_25 {dimension_numbers = #tpu.dot_dimension_numbers<[1], [0], [0], [1], [0, 0, 1, 1], [], []>} : vector<16x8xf32>, vector<8x32xf32>, vector<16x32xf32> -> vector<16x32xf32>
    %95 = arith.addf %67, %94 : vector<16x32xf32>
    %96 = vector.extract_strided_slice %35 {offsets = [0, 16], sizes = [16, 8], strides = [1, 1]} : vector<16x96xf32> to vector<16x8xf32>
    %97 = vector.shape_cast %96 : vector<16x8xf32> to vector<2x8x8xf32>
    %98 = vector.extract_strided_slice %35 {offsets = [0, 48], sizes = [16, 8], strides = [1, 1]} : vector<16x96xf32> to vector<16x8xf32>
    %99 = vector.shape_cast %98 : vector<16x8xf32> to vector<2x8x8xf32>
    %100 = vector.extract_strided_slice %35 {offsets = [0, 80], sizes = [16, 8], strides = [1, 1]} : vector<16x96xf32> to vector<16x8xf32>
    %101 = vector.shape_cast %100 : vector<16x8xf32> to vector<2x8x8xf32>
    "tpu.trace_start"() <{level = 10 : i32, message = "bqd,bkd->bqk"}> : () -> ()
    %cst_26 = arith.constant dense<0.000000e+00> : vector<2x8x8xf32>
    %102 = tpu.matmul %97, %99, %cst_26 {dimension_numbers = #tpu.dot_dimension_numbers<[2], [2], [1], [1], [0, 0, 0, 1, 1, 1], [0], [0]>} : vector<2x8x8xf32>, vector<2x8x8xf32>, vector<2x8x8xf32> -> vector<2x8x8xf32>
    "tpu.trace_stop"() : () -> ()
    %cst_27 = arith.constant 0.353553385 : f32
    %103 = vector.broadcast %cst_27 : f32 to vector<2x8x8xf32>
    %104 = arith.mulf %102, %103 : vector<2x8x8xf32>
    %cst_28 = arith.constant -1.000000e+30 : f32
    %105 = vector.shape_cast %39 : vector<1x8x8xi1> to vector<1x8x8xi1>
    %106 = vector.broadcast %105 : vector<1x8x8xi1> to vector<2x8x8xi1>
    %107 = vector.broadcast %cst_28 : f32 to vector<2x8x8xf32>
    %108 = arith.select %106, %104, %107 : vector<2x8x8xi1>, vector<2x8x8xf32>
    %cst_29 = arith.constant dense<0xFF800000> : vector<2x8xf32>
    %109 = vector.multi_reduction <maximumf>, %108, %cst_29 [2] : vector<2x8x8xf32> to vector<2x8xf32>
    %110 = vector.shape_cast %109 : vector<2x8xf32> to vector<2x8x1xf32>
    %111 = vector.broadcast %110 : vector<2x8x1xf32> to vector<2x8x8xf32>
    %112 = arith.subf %108, %111 : vector<2x8x8xf32>
    %113 = math.exp %112 : vector<2x8x8xf32>
    %cst_30 = arith.constant dense<0.000000e+00> : vector<2x8xf32>
    %114 = vector.multi_reduction <add>, %113, %cst_30 [2] : vector<2x8x8xf32> to vector<2x8xf32>
    %115 = vector.shape_cast %114 : vector<2x8xf32> to vector<2x8x1xf32>
    %116 = tpu.reciprocal %115 {approx = true} : vector<2x8x1xf32> -> vector<2x8x1xf32>
    %117 = vector.broadcast %116 : vector<2x8x1xf32> to vector<2x8x8xf32>
    %118 = arith.mulf %113, %117 : vector<2x8x8xf32>
    "tpu.trace_start"() <{level = 10 : i32, message = "bqk,bkd->bqd"}> : () -> ()
    %cst_31 = arith.constant dense<0.000000e+00> : vector<2x8x8xf32>
    %119 = tpu.matmul %118, %101, %cst_31 {dimension_numbers = #tpu.dot_dimension_numbers<[2], [1], [1], [2], [0, 0, 0, 1, 1, 2], [0], [0]>} : vector<2x8x8xf32>, vector<2x8x8xf32>, vector<2x8x8xf32> -> vector<2x8x8xf32>
    "tpu.trace_stop"() : () -> ()
    %120 = vector.shape_cast %119 : vector<2x8x8xf32> to vector<16x8xf32>
    %121 = vector.extract_strided_slice %40 {offsets = [16, 0], sizes = [8, 32], strides = [1, 1]} : vector<32x32xf32> to vector<8x32xf32>
    %cst_32 = arith.constant dense<0.000000e+00> : vector<16x32xf32>
    %122 = tpu.matmul %120, %121, %cst_32 {dimension_numbers = #tpu.dot_dimension_numbers<[1], [0], [0], [1], [0, 0, 1, 1], [], []>} : vector<16x8xf32>, vector<8x32xf32>, vector<16x32xf32> -> vector<16x32xf32>
    %123 = arith.addf %95, %122 : vector<16x32xf32>
    %124 = vector.extract_strided_slice %35 {offsets = [0, 24], sizes = [16, 8], strides = [1, 1]} : vector<16x96xf32> to vector<16x8xf32>
    %125 = vector.shape_cast %124 : vector<16x8xf32> to vector<2x8x8xf32>
    %126 = vector.extract_strided_slice %35 {offsets = [0, 56], sizes = [16, 8], strides = [1, 1]} : vector<16x96xf32> to vector<16x8xf32>
    %127 = vector.shape_cast %126 : vector<16x8xf32> to vector<2x8x8xf32>
    %128 = vector.extract_strided_slice %35 {offsets = [0, 88], sizes = [16, 8], strides = [1, 1]} : vector<16x96xf32> to vector<16x8xf32>
    %129 = vector.shape_cast %128 : vector<16x8xf32> to vector<2x8x8xf32>
    "tpu.trace_start"() <{level = 10 : i32, message = "bqd,bkd->bqk"}> : () -> ()
    %cst_33 = arith.constant dense<0.000000e+00> : vector<2x8x8xf32>
    %130 = tpu.matmul %125, %127, %cst_33 {dimension_numbers = #tpu.dot_dimension_numbers<[2], [2], [1], [1], [0, 0, 0, 1, 1, 1], [0], [0]>} : vector<2x8x8xf32>, vector<2x8x8xf32>, vector<2x8x8xf32> -> vector<2x8x8xf32>
    "tpu.trace_stop"() : () -> ()
    %cst_34 = arith.constant 0.353553385 : f32
    %131 = vector.broadcast %cst_34 : f32 to vector<2x8x8xf32>
    %132 = arith.mulf %130, %131 : vector<2x8x8xf32>
    %cst_35 = arith.constant -1.000000e+30 : f32
    %133 = vector.shape_cast %39 : vector<1x8x8xi1> to vector<1x8x8xi1>
    %134 = vector.broadcast %133 : vector<1x8x8xi1> to vector<2x8x8xi1>
    %135 = vector.broadcast %cst_35 : f32 to vector<2x8x8xf32>
    %136 = arith.select %134, %132, %135 : vector<2x8x8xi1>, vector<2x8x8xf32>
    %cst_36 = arith.constant dense<0xFF800000> : vector<2x8xf32>
    %137 = vector.multi_reduction <maximumf>, %136, %cst_36 [2] : vector<2x8x8xf32> to vector<2x8xf32>
    %138 = vector.shape_cast %137 : vector<2x8xf32> to vector<2x8x1xf32>
    %139 = vector.broadcast %138 : vector<2x8x1xf32> to vector<2x8x8xf32>
    %140 = arith.subf %136, %139 : vector<2x8x8xf32>
    %141 = math.exp %140 : vector<2x8x8xf32>
    %cst_37 = arith.constant dense<0.000000e+00> : vector<2x8xf32>
    %142 = vector.multi_reduction <add>, %141, %cst_37 [2] : vector<2x8x8xf32> to vector<2x8xf32>
    %143 = vector.shape_cast %142 : vector<2x8xf32> to vector<2x8x1xf32>
    %144 = tpu.reciprocal %143 {approx = true} : vector<2x8x1xf32> -> vector<2x8x1xf32>
    %145 = vector.broadcast %144 : vector<2x8x1xf32> to vector<2x8x8xf32>
    %146 = arith.mulf %141, %145 : vector<2x8x8xf32>
    "tpu.trace_start"() <{level = 10 : i32, message = "bqk,bkd->bqd"}> : () -> ()
    %cst_38 = arith.constant dense<0.000000e+00> : vector<2x8x8xf32>
    %147 = tpu.matmul %146, %129, %cst_38 {dimension_numbers = #tpu.dot_dimension_numbers<[2], [1], [1], [2], [0, 0, 0, 1, 1, 2], [0], [0]>} : vector<2x8x8xf32>, vector<2x8x8xf32>, vector<2x8x8xf32> -> vector<2x8x8xf32>
    "tpu.trace_stop"() : () -> ()
    %148 = vector.shape_cast %147 : vector<2x8x8xf32> to vector<16x8xf32>
    %149 = vector.extract_strided_slice %40 {offsets = [24, 0], sizes = [8, 32], strides = [1, 1]} : vector<32x32xf32> to vector<8x32xf32>
    %cst_39 = arith.constant dense<0.000000e+00> : vector<16x32xf32>
    %150 = tpu.matmul %148, %149, %cst_39 {dimension_numbers = #tpu.dot_dimension_numbers<[1], [0], [0], [1], [0, 0, 1, 1], [], []>} : vector<16x8xf32>, vector<8x32xf32>, vector<16x32xf32> -> vector<16x32xf32>
    %151 = arith.addf %123, %150 : vector<16x32xf32>
    %152 = arith.addf %0, %151 : vector<16x32xf32>
    %153 = vector.broadcast %7 : vector<1x32xf32> to vector<16x32xf32>
    %154 = arith.addf %152, %153 : vector<16x32xf32>
    %cst_40 = arith.constant dense<0.000000e+00> : vector<16xf32>
    %155 = vector.multi_reduction <add>, %154, %cst_40 [1] : vector<16x32xf32> to vector<16xf32>
    %156 = vector.shape_cast %155 : vector<16xf32> to vector<16x1xf32>
    %cst_41 = arith.constant 3.200000e+01 : f32
    %157 = vector.broadcast %cst_41 : f32 to vector<16x1xf32>
    %158 = arith.divf %156, %157 : vector<16x1xf32>
    %159 = vector.broadcast %158 : vector<16x1xf32> to vector<16x32xf32>
    %160 = arith.subf %154, %159 : vector<16x32xf32>
    %161 = arith.mulf %160, %160 : vector<16x32xf32>
    %cst_42 = arith.constant dense<0.000000e+00> : vector<16xf32>
    %162 = vector.multi_reduction <add>, %161, %cst_42 [1] : vector<16x32xf32> to vector<16xf32>
    %163 = vector.shape_cast %162 : vector<16xf32> to vector<16x1xf32>
    %cst_43 = arith.constant 3.200000e+01 : f32
    %164 = vector.broadcast %cst_43 : f32 to vector<16x1xf32>
    %165 = arith.divf %163, %164 : vector<16x1xf32>
    %166 = vector.broadcast %158 : vector<16x1xf32> to vector<16x32xf32>
    %167 = arith.subf %154, %166 : vector<16x32xf32>
    %cst_44 = arith.constant 9.99999974E-6 : f32
    %168 = vector.broadcast %cst_44 : f32 to vector<16x1xf32>
    %169 = arith.addf %165, %168 : vector<16x1xf32>
    %170 = math.rsqrt %169 : vector<16x1xf32>
    %171 = vector.broadcast %170 : vector<16x1xf32> to vector<16x32xf32>
    %172 = arith.mulf %167, %171 : vector<16x32xf32>
    %173 = vector.broadcast %4 : vector<1x32xf32> to vector<16x32xf32>
    %174 = arith.mulf %172, %173 : vector<16x32xf32>
    %175 = vector.broadcast %5 : vector<1x32xf32> to vector<16x32xf32>
    %176 = arith.addf %174, %175 : vector<16x32xf32>
    %c0_45 = arith.constant 0 : index
    %c0_46 = arith.constant 0 : index
    %177 = vector.load %arg3[%c0_45, %c0_46] : memref<32x128xf32, #tpu.memory_space<vmem>>, vector<32x128xf32>
    %cst_47 = arith.constant dense<0.000000e+00> : vector<16x128xf32>
    %178 = tpu.matmul %176, %177, %cst_47 {dimension_numbers = #tpu.dot_dimension_numbers<[1], [0], [0], [1], [0, 0, 1, 1], [], []>} : vector<16x32xf32>, vector<32x128xf32>, vector<16x128xf32> -> vector<16x128xf32>
    %179 = vector.broadcast %9 : vector<1x128xf32> to vector<16x128xf32>
    %180 = arith.addf %178, %179 : vector<16x128xf32>
    %cst_48 = arith.constant 5.000000e-01 : f32
    %181 = vector.broadcast %cst_48 : f32 to vector<16x128xf32>
    %182 = arith.mulf %181, %180 : vector<16x128xf32>
    %cst_49 = arith.constant 0.707106769 : f32
    %183 = vector.broadcast %cst_49 : f32 to vector<16x128xf32>
    %184 = arith.mulf %180, %183 : vector<16x128xf32>
    %185 = math.absf %184 : vector<16x128xf32>
    %cst_50 = arith.constant 0.327591091 : f32
    %186 = vector.broadcast %cst_50 : f32 to vector<16x128xf32>
    %187 = arith.mulf %186, %185 : vector<16x128xf32>
    %cst_51 = arith.constant 1.000000e+00 : f32
    %188 = vector.broadcast %cst_51 : f32 to vector<16x128xf32>
    %189 = arith.addf %188, %187 : vector<16x128xf32>
    %cst_52 = arith.constant 1.000000e+00 : f32
    %190 = vector.broadcast %cst_52 : f32 to vector<16x128xf32>
    %191 = arith.divf %190, %189 : vector<16x128xf32>
    %cst_53 = arith.constant 1.06140542 : f32
    %192 = vector.broadcast %cst_53 : f32 to vector<16x128xf32>
    %193 = arith.mulf %192, %191 : vector<16x128xf32>
    %cst_54 = arith.constant 1.45315206 : f32
    %194 = vector.broadcast %cst_54 : f32 to vector<16x128xf32>
    %195 = arith.subf %193, %194 : vector<16x128xf32>
    %196 = arith.mulf %195, %191 : vector<16x128xf32>
    %cst_55 = arith.constant 1.42141378 : f32
    %197 = vector.broadcast %cst_55 : f32 to vector<16x128xf32>
    %198 = arith.addf %196, %197 : vector<16x128xf32>
    %199 = arith.mulf %198, %191 : vector<16x128xf32>
    %cst_56 = arith.constant 0.284496725 : f32
    %200 = vector.broadcast %cst_56 : f32 to vector<16x128xf32>
    %201 = arith.subf %199, %200 : vector<16x128xf32>
    %202 = arith.mulf %201, %191 : vector<16x128xf32>
    %cst_57 = arith.constant 0.254829586 : f32
    %203 = vector.broadcast %cst_57 : f32 to vector<16x128xf32>
    %204 = arith.addf %202, %203 : vector<16x128xf32>
    %205 = arith.mulf %204, %191 : vector<16x128xf32>
    %cst_58 = arith.constant 0.000000e+00 : f32
    %206 = vector.broadcast %cst_58 : f32 to vector<16x128xf32>
    %207 = arith.subf %206, %185 : vector<16x128xf32>
    %208 = arith.mulf %207, %185 : vector<16x128xf32>
    %209 = math.exp %208 : vector<16x128xf32>
    %210 = arith.mulf %205, %209 : vector<16x128xf32>
    %cst_59 = arith.constant 1.000000e+00 : f32
    %211 = vector.broadcast %cst_59 : f32 to vector<16x128xf32>
    %212 = arith.subf %211, %210 : vector<16x128xf32>
    %cst_60 = arith.constant 0.000000e+00 : f32
    %213 = vector.broadcast %cst_60 : f32 to vector<16x128xf32>
    %214 = arith.cmpf oge, %184, %213 : vector<16x128xf32>
    %cst_61 = arith.constant 0.000000e+00 : f32
    %215 = vector.broadcast %cst_61 : f32 to vector<16x128xf32>
    %216 = arith.subf %215, %212 : vector<16x128xf32>
    %217 = arith.select %214, %212, %216 : vector<16x128xi1>, vector<16x128xf32>
    %cst_62 = arith.constant 1.000000e+00 : f32
    %218 = vector.broadcast %cst_62 : f32 to vector<16x128xf32>
    %219 = arith.addf %218, %217 : vector<16x128xf32>
    %220 = arith.mulf %182, %219 : vector<16x128xf32>
    %c0_63 = arith.constant 0 : index
    %c0_64 = arith.constant 0 : index
    %221 = vector.load %arg4[%c0_63, %c0_64] : memref<128x32xf32, #tpu.memory_space<vmem>>, vector<128x32xf32>
    %cst_65 = arith.constant dense<0.000000e+00> : vector<16x32xf32>
    %222 = tpu.matmul %220, %221, %cst_65 {dimension_numbers = #tpu.dot_dimension_numbers<[1], [0], [0], [1], [0, 0, 1, 1], [], []>} : vector<16x128xf32>, vector<128x32xf32>, vector<16x32xf32> -> vector<16x32xf32>
    %223 = vector.broadcast %8 : vector<1x32xf32> to vector<16x32xf32>
    %224 = arith.addf %222, %223 : vector<16x32xf32>
    %225 = arith.addf %154, %224 : vector<16x32xf32>
    %c0_66 = arith.constant 0 : index
    %c0_67 = arith.constant 0 : index
    %226 = vector.load %arg6[%c0_66, %c0_67] : memref<16x32xf32, #tpu.memory_space<vmem>>, vector<16x32xf32>
    tpu.vector_store %arg6[%c0_66, %c0_67], %225 {strides = array<i32>} : memref<16x32xf32, #tpu.memory_space<vmem>>, vector<16x32xf32>,
    return
  }
}

</mosaic_0001>

<bundles_post_ra>
// kernel: transformer_block.1
= control target key start
LH: loop header
LB: loop body
LE: loop exit
PB: predicated region body
PF: predicated region fallthrough
CT: control target
= control target key end

     0   :  { %vm27_vm0 = vcmask 261120   ;;  %s2859_s0 = inlined_call_operand.vmem [shape: f32[16,32], index: 0, kind: input, shape index: {}]   ;;  %s2860_s1 = inlined_call_operand.vmem [shape: f32[32,96], index: 1, kind: input, shape index: {}]   ;;  %s2861_s2 = inlined_call_operand.vmem [shape: f32[32,32], index: 2, kind: input, shape index: {}]   ;;  %s2862_s3 = inlined_call_operand.vmem [shape: f32[32,128], index: 3, kind: input, shape index: {}]   ;;  %s2863_s4 = inlined_call_operand.vmem [shape: f32[128,32], index: 4, kind: input, shape index: {}]   ;;  %s2864_s5 = inlined_call_operand.vmem [shape: f32[4,128], index: 5, kind: input, shape index: {}]   ;;  %s2865_s6 = inlined_call_operand.hbm [shape: f32[16,32], index: 6, kind: output, shape index: {}]  }
   0x1   :  { %v2545_v0 = vld [vmem:[%s2859_s0] sm:$0xff]  ;;  %v2550_v1 = vld [vmem:[%s2859_s0 + $0x8] sm:$0xff] }
   0x2   :  { %11 = vsyncpa [#allocation3], 0  ;;  %v28_v2 = vsel %vm27_vm0, %v2545_v0, 0.0  ;;  %v31_v3 = vsel %vm27_vm0, %v2550_v1, 0.0  ;;  %v55_v4 = vlaneseq  ;;  %v2562_v6 = vld [vmem:[%s2864_s5] sm:$0xf] }
   0x3   :  { %29 = vadd.xlane.f32.xlu0 %v28_v2  ;;  %s2490_s0 = smov 96   ;;  %v70_v19 = vld [vmem:[%s2860_s1 + $0x18] sm:$0xff]  ;;  %v69_v20 = vld [vmem:[%s2860_s1 + $0x10] sm:$0xff]  ;;  %v68_v21 = vld [vmem:[%s2860_s1 + $0x8] sm:$0xff]  ;;  %v2491_v38 = vmov 0.0   ;;  %vm2492_vm1 = vmmov 0  }
   0x4   :  { %v2557_v5 = vshrl.u32 %v55_v4, 7  ;;  %2246 = vmatprep.subr.mxu0 %v70_v19  ;;  %v67_v22 = vld [vmem:[%s2860_s1] sm:$0xff]  ;;  %2282 = vmatprep.subr.mxu1 %v2491_v38  ;;  %vm168_vm2 = vcmask 64512   ;;  %v159_v47 = vand.u32 127, %v55_v4  ;;  %s2493_s1 = smov 64   ;;  %s2494_s10 = smov 88  }
   0x5   :  { %2247 = vmatpush3.msra.mxu0 %v70_v19  ;;  %2284 = vmatprep.mubr.msk.f32.mxu1 %vm2492_vm1, %v2491_v38  ;;  %s2495_s11 = smov 120   ;;  %s2496_s12 = smov 56  }
   0x6   :  { %v57_v7 = vsub.s32 0, %v2557_v5  ;;  %2248 = vmatprep.subr.mxu0 %v69_v20  ;;  %v73_v39 = vsub.s32 1, %v2557_v5  ;;  %vm2620_vm3 = vcmp.le.s32.totalorder %v159_v47, %v2557_v5  ;;  %s2497_s13 = smov 80   ;;  %s2498_s14 = smov 112  }
   0x7   :  { %32 = vadd.xlane.f32.xlu0 %v31_v3  ;;  %2249 = vmatpush3.msra.mxu0 %v69_v20  ;;  %s2499_s19 = smov 48   ;;  %s2500_s20 = smov 72  }
   0x8   :  { %v2566_v8 = vrot.slane %v2562_v6, %v57_v7  ;;  %2250 = vmatprep.subr.mxu0 %v68_v21  ;;  %v74_v41 = vrot.slane %v2562_v6, %v73_v39  ;;  %s2501_s21 = smov 104   ;;  %s2502_s24 = smov 40  }
   0x9   :  { %2251 = vmatpush3.msra.mxu0 %v68_v21  ;;  %s2503_s27 = smov 32  }
   0xa   :  { %2252 = vmatprep.subr.mxu0 %v67_v22 }
   0xb   :  { %2253 = vmatpush3.msra.mxu0 %v67_v22 }
   0xc   :  { %2257 = vmatprep.subr.mxu0 %v2491_v38 }
  0x1d   :  { %62 = vrot.lane.b32.xlu0 %v2566_v8, %s2490_s0 }
  0x8c   :  { %v30_v9 = vpop.xlane.xlu0 %29 }
  0x8d   :  { %v35_v10 = vmul.f32 0.03125, %v30_v9 }
  0x8f   :  { %v37_v11 = vsub.f32 %v2545_v0, %v35_v10 }
  0x90   :  { %v33_v12 = vpop.xlane.xlu0 %32 }
  0x91   :  { %v36_v13 = vmul.f32 0.03125, %v33_v12  ;;  %v39_v14 = vmul.f32 %v37_v11, %v37_v11 }
  0x93   :  { %v38_v15 = vsub.f32 %v2550_v1, %v36_v13  ;;  %v41_v16 = vsel %vm27_vm0, %v39_v14, 0.0 }
  0x94   :  { %42 = vadd.xlane.f32.xlu1 %v41_v16  ;;  %v63_v31 = vpop.permute.xlu0 %62 }
  0x95   :  { %v40_v17 = vmul.f32 %v38_v15, %v38_v15 }
  0x97   :  { %v44_v18 = vsel %vm27_vm0, %v40_v17, 0.0 }
  0x98   :  { %45 = vadd.xlane.f32.xlu1 %v44_v18 }
 0x11d   :  { %v43_v23 = vpop.xlane.xlu1 %42 }
 0x11e   :  { %v47_v24 = vmul.f32 0.03125, %v43_v23 }
 0x120   :  { %v49_v25 = vadd.f32 1e-05, %v47_v24 }
 0x121   :  { %v46_v26 = vpop.xlane.xlu1 %45 }
 0x122   :  { %2420 = vrsqrt.f32 %v49_v25  ;;  %v48_v27 = vmul.f32 0.03125, %v46_v26 }
 0x124   :  { %v50_v28 = vadd.f32 1e-05, %v48_v27 }
 0x126   :  { %2422 = vrsqrt.f32 %v50_v28 }
 0x12f   :  { %v2421_v29 = vpop.eup %2420 }
 0x130   :  { %v53_v30 = vmul.f32 %v2421_v29, %v37_v11 }
 0x132   :  { %v59_v32 = vmul.f32 %v2566_v8, %v53_v30 }
 0x133   :  { %v2423_v33 = vpop.eup %2422 }
 0x134   :  { %v54_v34 = vmul.f32 %v2423_v33, %v38_v15  ;;  %v65_v35 = vadd.f32 %v63_v31, %v59_v32 }
 0x136   :  { %v60_v36 = vmul.f32 %v2566_v8, %v54_v34  ;;  %2254 = vmatprep.mubr.msk.f32.mxu0 %vm27_vm0, %v65_v35 }
 0x138   :  { %v66_v37 = vadd.f32 %v63_v31, %v60_v36 }
 0x13a   :  { %2255 = vmatmul.mubr.msk.f32.vlgmr.msra.gmra.mxu0 %vm27_vm0, %v66_v37 }
 0x13b   :  { %2259 = vmatprep.mubr.msk.f32.mxu0 %vm2492_vm1, %v2491_v38 }
 0x1fa   :  { %v2256_v40 = vpop.f32.mrf.mxu0 }
 0x1fb   :  { %v2602_v44 = vadd.f32 %v2256_v40, %v74_v41 }
 0x1fc   :  { %v147_v42 = vpop.f32.mrf.mxu0 }
 0x1fd   :  { %v2598_v43 = vadd.f32 %v147_v42, %v74_v41 }
 0x1ff   :  { %166 = vrot.lane.b32.xlu1 %v2598_v43, %s2490_s0 }
 0x203   :  { %244 = vrot.lane.b32.xlu1 %v2602_v44, %s2490_s0 }
 0x271   :  { %v167_v45 = vpop.permute.xlu1 %166 }
 0x272   :  { %2258 = vmatpush3.xpose.msk.msra.mxu0 %vm168_vm2, %v167_v45 }
 0x273   :  { %2262 = vmatprep.subr.mxu0 %v2491_v38 }
 0x275   :  { %2260 = vmatmul.mubr.msk.f32.vlgmr.msra.gmra.mxu0 %vm168_vm2, %v2598_v43  ;;  %v245_v46 = vpop.permute.xlu1 %244 }
 0x276   :  { %2263 = vmatpush3.xpose.msk.msra.mxu0 %vm168_vm2, %v245_v46  ;;  %2264 = vmatprep.mubr.msk.f32.mxu0 %vm2492_vm1, %v2491_v38 }
 0x277   :  { %2267 = vmatprep.subr.mxu0 %v2491_v38 }
 0x279   :  { %2265 = vmatmul.mubr.msk.f32.vlgmr.msra.gmra.mxu0 %vm168_vm2, %v2602_v44 }
 0x27a   :  { %2269 = vmatprep.mubr.msk.f32.mxu0 %vm2492_vm1, %v2491_v38 }
 0x335   :  { %v239_v48 = vpop.f32.mrf.mxu0 }
 0x336   :  { %v320_v50 = vmul.f32 0.35355338, %v239_v48 }
 0x337   :  { %v2261_v51 = vpop.f32.mrf.mxu0 }
 0x338   :  { %v324_v52 = vsel %vm2620_vm3, %v320_v50, -1e+30 }
 0x339   :  { %v316_v53 = vpop.f32.mrf.mxu0  ;;  %v326_v54 = vsel %vm168_vm2, %v324_v52, -inf }
 0x33a   :  { %v321_v55 = vmul.f32 0.35355338, %v316_v53  ;;  %327 = vmax.xlane.f32.xlu1 %v326_v54 }
 0x33b   :  { %v2266_v56 = vpop.f32.mrf.mxu0 }
 0x33c   :  { %v325_v57 = vsel %vm2620_vm3, %v321_v55, -1e+30  ;;  %v161_v55 = vld [vmem:[%s2861_s2] sm:$0xff] }
 0x33d   :  { %v329_v58 = vsel %vm168_vm2, %v325_v57, -inf }
 0x33e   :  { %330 = vmax.xlane.f32.xlu0 %v329_v58 }
 0x34b   :  { %348 = vrot.lane.b32.xlu1 %v2598_v43, %s2493_s1 }
 0x34f   :  { %502 = vrot.lane.b32.xlu1 %v2598_v43, %s2494_s10 }
 0x353   :  { %580 = vrot.lane.b32.xlu1 %v2602_v44, %s2494_s10 }
 0x357   :  { %500 = vrot.lane.b32.xlu1 %v2598_v43, %s2495_s11 }
 0x3c3   :  { %v328_v59 = vpop.xlane.xlu1 %327 }
 0x3c4   :  { %v332_v60 = vsub.f32 %v324_v52, %v328_v59 }
 0x3c6   :  { %v334_v61 = vmul.f32 1.442695, %v332_v60 }
 0x3c7   :  { %v331_v62 = vpop.xlane.xlu0 %330  ;;  %v349_v63 = vpop.permute.xlu1 %348 }
 0x3c8   :  { %2424 = vpow2.f32 %v334_v61  ;;  %v333_v2 = vsub.f32 %v325_v57, %v331_v62  ;;  %2268 = vmatpush3.msra.mxu0 %v349_v63  ;;  %v162_v62 = vld [vmem:[%s2861_s2 + $0x8] sm:$0xff] }
 0x3c9   :  { %2272 = vmatprep.subr.mxu0 %v2491_v38 }
 0x3ca   :  { %v336_v3 = vmul.f32 1.442695, %v333_v2 }
 0x3cb   :  { %v503_v4 = vpop.permute.xlu1 %502 }
 0x3cc   :  { %2426 = vpow2.f32 %v336_v3 }
 0x3cf   :  { %v581_v7 = vpop.permute.xlu1 %580 }
 0x3d0   :  { %2283 = vmatpush3.xpose.msk.msra.mxu1 %vm168_vm2, %v581_v7 }
 0x3d1   :  { %2292 = vmatprep.subr.mxu1 %v2491_v38 }
 0x3d3   :  { %v501_v21 = vpop.permute.xlu1 %500 }
 0x3d5   :  { %v2425_v9 = vpop.eup %2424 }
 0x3d6   :  { %v338_v10 = vsel %vm168_vm2, %v2425_v9, 0.0 }
 0x3d7   :  { %339 = vadd.xlane.f32.xlu0 %v338_v10 }
 0x3d9   :  { %v2427_v11 = vpop.eup %2426 }
 0x3da   :  { %v341_v12 = vsel %vm168_vm2, %v2427_v11, 0.0 }
 0x3db   :  { %342 = vadd.xlane.f32.xlu0 %v341_v12 }
 0x3f1   :  { %424 = vrot.lane.b32.xlu0 %v2602_v44, %s2493_s1 }
 0x3f5   :  { %578 = vrot.lane.b32.xlu0 %v2602_v44, %s2495_s11 }
 0x460   :  { %v340_v13 = vpop.xlane.xlu0 %339 }
 0x461   :  { %2428 = vrcp.f32 %v340_v13 }
 0x464   :  { %v343_v14 = vpop.xlane.xlu0 %342 }
 0x465   :  { %2430 = vrcp.f32 %v343_v14 }
 0x468   :  { %v425_v15 = vpop.permute.xlu0 %424 }
 0x46c   :  { %v579_v16 = vpop.permute.xlu0 %578 }
 0x46d   :  { %2285 = vmatmul.mubr.msk.f32.vlgmr.msra.gmra.mxu1 %vm168_vm2, %v579_v16 }
 0x46e   :  { %v2429_v17 = vpop.eup %2428  ;;  %2294 = vmatprep.mubr.msk.f32.mxu1 %vm2492_vm1, %v2491_v38 }
 0x46f   :  { %v346_v18 = vmul.f32 %v2429_v17, %v2425_v9 }
 0x471   :  { %2270 = vmatmul.mubr.msk.f32.vlgmr.msra.gmra.mxu0 %vm168_vm2, %v346_v18 }
 0x472   :  { %v2431_v19 = vpop.eup %2430  ;;  %2273 = vmatpush3.msra.mxu0 %v425_v15  ;;  %2274 = vmatprep.mubr.msk.f32.mxu0 %vm2492_vm1, %v2491_v38 }
 0x473   :  { %2277 = vmatprep.subr.mxu0 %v2491_v38  ;;  %v347_v20 = vmul.f32 %v2431_v19, %v2427_v11 }
 0x475   :  { %2275 = vmatmul.mubr.msk.f32.vlgmr.msra.gmra.mxu0 %vm168_vm2, %v347_v20 }
 0x476   :  { %2278 = vmatpush3.xpose.msk.msra.mxu0 %vm168_vm2, %v503_v4  ;;  %2279 = vmatprep.mubr.msk.f32.mxu0 %vm2492_vm1, %v2491_v38 }
 0x477   :  { %2287 = vmatprep.subr.mxu0 %v2491_v38 }
 0x479   :  { %2280 = vmatmul.mubr.msk.f32.vlgmr.msra.gmra.mxu0 %vm168_vm2, %v501_v21 }
 0x47a   :  { %2289 = vmatprep.mubr.msk.f32.mxu0 %vm2492_vm1, %v2491_v38 }
 0x52d   :  { %v652_v22 = vpop.f32.mrf.mxu1 }
 0x52e   :  { %v657_v23 = vmul.f32 0.35355338, %v652_v22 }
 0x52f   :  { %v2286_v24 = vpop.f32.mrf.mxu1 }
 0x530   :  { %v659_v25 = vsel %vm2620_vm3, %v657_v23, -1e+30 }
 0x531   :  { %v420_v26 = vpop.f32.mrf.mxu0  ;;  %v663_v27 = vsel %vm168_vm2, %v659_v25, -inf }
 0x532   :  { %664 = vmax.xlane.f32.xlu0 %v663_v27 }
 0x533   :  { %v2271_v28 = vpop.f32.mrf.mxu0 }
 0x535   :  { %v496_v29 = vpop.f32.mrf.mxu0 }
 0x537   :  { %v2276_v30 = vpop.f32.mrf.mxu0 }
 0x539   :  { %v574_v31 = vpop.f32.mrf.mxu0 }
 0x53a   :  { %v656_v32 = vmul.f32 0.35355338, %v574_v31 }
 0x53b   :  { %v2281_v33 = vpop.f32.mrf.mxu0 }
 0x53c   :  { %v658_v34 = vsel %vm2620_vm3, %v656_v32, -1e+30 }
 0x53d   :  { %v660_v35 = vsel %vm168_vm2, %v658_v34, -inf }
 0x53e   :  { %661 = vmax.xlane.f32.xlu1 %v660_v35 }
 0x54f   :  { %682 = vrot.lane.b32.xlu1 %v2598_v43, %s2496_s12 }
 0x553   :  { %998 = vrot.lane.b32.xlu1 %v2598_v43, %s2497_s13 }
 0x557   :  { %1076 = vrot.lane.b32.xlu1 %v2602_v44, %s2497_s13 }
 0x55b   :  { %996 = vrot.lane.b32.xlu1 %v2598_v43, %s2498_s14 }
 0x5bb   :  { %v665_v36 = vpop.xlane.xlu0 %664 }
 0x5bc   :  { %v667_v37 = vsub.f32 %v659_v25, %v665_v36 }
 0x5be   :  { %v670_v39 = vmul.f32 1.442695, %v667_v37 }
 0x5c0   :  { %2432 = vpow2.f32 %v670_v39 }
 0x5c7   :  { %v662_v40 = vpop.xlane.xlu1 %661 }
 0x5c8   :  { %v666_v41 = vsub.f32 %v658_v34, %v662_v40 }
 0x5ca   :  { %v668_v42 = vmul.f32 1.442695, %v666_v41 }
 0x5cb   :  { %v683_v45 = vpop.permute.xlu1 %682 }
 0x5cc   :  { %2434 = vpow2.f32 %v668_v42  ;;  %2288 = vmatpush3.msra.mxu0 %v683_v45 }
 0x5cd   :  { %v2433_v46 = vpop.eup %2432  ;;  %2297 = vmatprep.subr.mxu0 %v162_v62 }
 0x5ce   :  { %v675_v47 = vsel %vm168_vm2, %v2433_v46, 0.0 }
 0x5cf   :  { %676 = vadd.xlane.f32.xlu0 %v675_v47  ;;  %v999_v56 = vpop.permute.xlu1 %998  ;;  %v163_v47 = vld [vmem:[%s2861_s2 + $0x10] sm:$0xff] }
 0x5d3   :  { %v1077_v58 = vpop.permute.xlu1 %1076 }
 0x5d7   :  { %v997_v15 = vpop.permute.xlu1 %996 }
 0x5d9   :  { %v2435_v48 = vpop.eup %2434 }
 0x5da   :  { %v672_v50 = vsel %vm168_vm2, %v2435_v48, 0.0 }
 0x5db   :  { %673 = vadd.xlane.f32.xlu0 %v672_v50 }
 0x5f1   :  { %758 = vrot.lane.b32.xlu0 %v2602_v44, %s2496_s12 }
 0x5f5   :  { %1074 = vrot.lane.b32.xlu0 %v2602_v44, %s2498_s14 }
 0x658   :  { %v677_v51 = vpop.xlane.xlu0 %676 }
 0x659   :  { %2436 = vrcp.f32 %v677_v51 }
 0x664   :  { %v674_v52 = vpop.xlane.xlu0 %673 }
 0x665   :  { %2438 = vrcp.f32 %v674_v52 }
 0x666   :  { %v2437_v53 = vpop.eup %2436 }
 0x667   :  { %v681_v54 = vmul.f32 %v2437_v53, %v2433_v46 }
 0x668   :  { %v759_v57 = vpop.permute.xlu0 %758 }
 0x669   :  { %2293 = vmatpush3.msra.mxu1 %v759_v57 }
 0x66a   :  { %2295 = vmatmul.mubr.msk.f32.vlgmr.msra.gmra.mxu1 %vm168_vm2, %v681_v54  ;;  %2302 = vmatprep.subr.mxu1 %v161_v55 }
 0x66b   :  { %2304 = vmatprep.mubr.msk.f32.mxu1 %vm168_vm2, %v420_v26  ;;  %2303 = vmatpush3.msra.mxu1 %v161_v55 }
 0x66c   :  { %2312 = vmatprep.subr.mxu1 %v2491_v38  ;;  %v1075_v59 = vpop.permute.xlu0 %1074 }
 0x66e   :  { %2305 = vmatmul.mubr.msk.f32.vlgmr.msra.gmra.mxu1 %vm168_vm2, %v496_v29 }
 0x66f   :  { %2313 = vmatpush3.xpose.msk.msra.mxu1 %vm168_vm2, %v1077_v58  ;;  %2314 = vmatprep.mubr.msk.f32.mxu1 %vm2492_vm1, %v2491_v38 }
 0x670   :  { %2322 = vmatprep.subr.mxu1 %v2491_v38 }
 0x672   :  { %v2439_v60 = vpop.eup %2438  ;;  %2315 = vmatmul.mubr.msk.f32.vlgmr.msra.gmra.mxu1 %vm168_vm2, %v1075_v59 }
 0x673   :  { %v680_v61 = vmul.f32 %v2439_v60, %v2435_v48  ;;  %2324 = vmatprep.mubr.msk.f32.mxu1 %vm2492_vm1, %v2491_v38 }
 0x675   :  { %2290 = vmatmul.mubr.msk.f32.vlgmr.msra.gmra.mxu0 %vm168_vm2, %v680_v61 }
 0x676   :  { %2298 = vmatpush3.msra.mxu0 %v162_v62 }
 0x677   :  { %2307 = vmatprep.subr.mxu0 %v2491_v38 }
 0x72a   :  { %v830_v63 = vpop.f32.mrf.mxu1 }
 0x72c   :  { %v2296_v2 = vpop.f32.mrf.mxu1 }
 0x72e   :  { %v2691_v3 = vpop.f32.mrf.mxu1 }
 0x730   :  { %v2693_v4 = vpop.f32.mrf.mxu1 }
 0x732   :  { %v1148_v7 = vpop.f32.mrf.mxu1 }
 0x733   :  { %v1153_v9 = vmul.f32 0.35355338, %v1148_v7 }
 0x734   :  { %v2316_v10 = vpop.f32.mrf.mxu1 }
 0x735   :  { %v754_v11 = vpop.f32.mrf.mxu0  ;;  %v1155_v12 = vsel %vm2620_vm3, %v1153_v9, -1e+30 }
 0x736   :  { %2299 = vmatprep.mubr.msk.f32.mxu0 %vm168_vm2, %v754_v11  ;;  %v1159_v13 = vsel %vm168_vm2, %v1155_v12, -inf }
 0x737   :  { %1160 = vmax.xlane.f32.xlu0 %v1159_v13  ;;  %v2291_v14 = vpop.f32.mrf.mxu0  ;;  %2300 = vmatmul.mubr.msk.f32.vlgmr.msra.gmra.mxu0 %vm168_vm2, %v830_v63 }
 0x738   :  { %2308 = vmatpush3.xpose.msk.msra.mxu0 %vm168_vm2, %v999_v56  ;;  %2309 = vmatprep.mubr.msk.f32.mxu0 %vm2492_vm1, %v2491_v38 }
 0x739   :  { %2317 = vmatprep.subr.mxu0 %v2491_v38 }
 0x73b   :  { %2310 = vmatmul.mubr.msk.f32.vlgmr.msra.gmra.mxu0 %vm168_vm2, %v997_v15 }
 0x73c   :  { %2319 = vmatprep.mubr.msk.f32.mxu0 %vm2492_vm1, %v2491_v38 }
 0x7c0   :  { %v1161_v16 = vpop.xlane.xlu0 %1160 }
 0x7c1   :  { %v1163_v17 = vsub.f32 %v1155_v12, %v1161_v16 }
 0x7c3   :  { %v1166_v18 = vmul.f32 1.442695, %v1163_v17 }
 0x7c5   :  { %2440 = vpow2.f32 %v1166_v18 }
 0x7d2   :  { %v2441_v19 = vpop.eup %2440 }
 0x7d3   :  { %v1171_v20 = vsel %vm168_vm2, %v2441_v19, 0.0 }
 0x7d4   :  { %1172 = vadd.xlane.f32.xlu0 %v1171_v20 }
 0x7f7   :  { %v2708_v21 = vpop.f32.mrf.mxu0 }
 0x7f8   :  { %v993_v63 = vadd.f32 %v2691_v3, %v2708_v21 }
 0x7f9   :  { %v2710_v22 = vpop.f32.mrf.mxu0 }
 0x7fa   :  { %v988_v7 = vadd.f32 %v2693_v4, %v2710_v22  ;;  %v164_v22 = vld [vmem:[%s2861_s2 + $0x18] sm:$0xff] }
 0x7fb   :  { %v1070_v23 = vpop.f32.mrf.mxu0 }
 0x7fc   :  { %v1152_v24 = vmul.f32 0.35355338, %v1070_v23 }
 0x7fd   :  { %v2311_v25 = vpop.f32.mrf.mxu0 }
 0x7fe   :  { %v1154_v26 = vsel %vm2620_vm3, %v1152_v24, -1e+30 }
 0x7ff   :  { %v1156_v27 = vsel %vm168_vm2, %v1154_v26, -inf }
 0x800   :  { %1157 = vmax.xlane.f32.xlu1 %v1156_v27 }
 0x811   :  { %1178 = vrot.lane.b32.xlu1 %v2598_v43, %s2499_s19 }
 0x815   :  { %1415 = vrot.lane.b32.xlu1 %v2598_v43, %s2500_s20 }
 0x819   :  { %1493 = vrot.lane.b32.xlu1 %v2602_v44, %s2500_s20 }
 0x81d   :  { %1413 = vrot.lane.b32.xlu1 %v2598_v43, %s2501_s21 }
 0x85d   :  { %v1173_v34 = vpop.xlane.xlu0 %1172 }
 0x889   :  { %v1158_v28 = vpop.xlane.xlu1 %1157 }
 0x88a   :  { %v1162_v29 = vsub.f32 %v1154_v26, %v1158_v28 }
 0x88c   :  { %v1164_v30 = vmul.f32 1.442695, %v1162_v29 }
 0x88d   :  { %v1179_v31 = vpop.permute.xlu1 %1178 }
 0x88e   :  { %2442 = vpow2.f32 %v1164_v30  ;;  %2318 = vmatpush3.msra.mxu0 %v1179_v31  ;;  %v1834_v30 = vsub.s32 2, %v2557_v5 }
 0x88f   :  { %2444 = vrcp.f32 %v1173_v34  ;;  %2327 = vmatprep.subr.mxu0 %v163_v47 }
 0x891   :  { %v1416_v35 = vpop.permute.xlu1 %1415 }
 0x895   :  { %v1494_v39 = vpop.permute.xlu1 %1493 }
 0x899   :  { %v1414_v42 = vpop.permute.xlu1 %1413 }
 0x89b   :  { %v2443_v32 = vpop.eup %2442 }
 0x89c   :  { %v1168_v33 = vsel %vm168_vm2, %v2443_v32, 0.0  ;;  %v2445_v37 = vpop.eup %2444 }
 0x89d   :  { %1169 = vadd.xlane.f32.xlu0 %v1168_v33  ;;  %v1177_v41 = vmul.f32 %v2445_v37, %v2441_v19  ;;  %v1835_v33 = vrot.slane %v2562_v6, %v1834_v30 }
 0x8b3   :  { %1254 = vrot.lane.b32.xlu0 %v2602_v44, %s2499_s19 }
 0x8b7   :  { %1491 = vrot.lane.b32.xlu0 %v2602_v44, %s2501_s21 }
 0x926   :  { %v1170_v36 = vpop.xlane.xlu0 %1169 }
 0x927   :  { %2446 = vrcp.f32 %v1170_v36 }
 0x92a   :  { %v1255_v40 = vpop.permute.xlu0 %1254 }
 0x92b   :  { %2323 = vmatpush3.msra.mxu1 %v1255_v40 }
 0x92c   :  { %2325 = vmatmul.mubr.msk.f32.vlgmr.msra.gmra.mxu1 %vm168_vm2, %v1177_v41  ;;  %2332 = vmatprep.subr.mxu1 %v2491_v38 }
 0x92d   :  { %2333 = vmatpush3.xpose.msk.msra.mxu1 %vm168_vm2, %v1416_v35  ;;  %2334 = vmatprep.mubr.msk.f32.mxu1 %vm2492_vm1, %v2491_v38 }
 0x92e   :  { %2342 = vmatprep.subr.mxu1 %v2491_v38  ;;  %v1492_v58 = vpop.permute.xlu0 %1491 }
 0x930   :  { %2335 = vmatmul.mubr.msk.f32.vlgmr.msra.gmra.mxu1 %vm168_vm2, %v1414_v42 }
 0x931   :  { %2344 = vmatprep.mubr.msk.f32.mxu1 %vm2492_vm1, %v2491_v38 }
 0x934   :  { %v2447_v45 = vpop.eup %2446 }
 0x935   :  { %v1176_v46 = vmul.f32 %v2447_v45, %v2443_v32 }
 0x937   :  { %2320 = vmatmul.mubr.msk.f32.vlgmr.msra.gmra.mxu0 %vm168_vm2, %v1176_v46 }
 0x938   :  { %2328 = vmatpush3.msra.mxu0 %v163_v47 }
 0x939   :  { %2337 = vmatprep.subr.mxu0 %v2491_v38 }
 0x9ec   :  { %v1326_v48 = vpop.f32.mrf.mxu1 }
 0x9ee   :  { %v2326_v50 = vpop.f32.mrf.mxu1 }
 0x9f0   :  { %v1487_v51 = vpop.f32.mrf.mxu1 }
 0x9f1   :  { %v1569_v52 = vmul.f32 0.35355338, %v1487_v51 }
 0x9f2   :  { %v2336_v53 = vpop.f32.mrf.mxu1 }
 0x9f3   :  { %v1571_v54 = vsel %vm2620_vm3, %v1569_v52, -1e+30 }
 0x9f4   :  { %v1573_v55 = vsel %vm168_vm2, %v1571_v54, -inf }
 0x9f5   :  { %1574 = vmax.xlane.f32.xlu1 %v1573_v55  ;;  %v1876_v55 = vld [vmem:[%s2862_s3 + $0x10] sm:$0xff] }
 0x9f7   :  { %v1250_v56 = vpop.f32.mrf.mxu0 }
 0x9f8   :  { %2329 = vmatprep.mubr.msk.f32.mxu0 %vm168_vm2, %v1250_v56  ;;  %v1875_v56 = vld [vmem:[%s2862_s3 + $0x8] sm:$0xff] }
 0x9f9   :  { %v2321_v57 = vpop.f32.mrf.mxu0  ;;  %2330 = vmatmul.mubr.msk.f32.vlgmr.msra.gmra.mxu0 %vm168_vm2, %v1326_v48 }
 0x9fa   :  { %2338 = vmatpush3.xpose.msk.msra.mxu0 %vm168_vm2, %v1494_v39  ;;  %2339 = vmatprep.mubr.msk.f32.mxu0 %vm2492_vm1, %v2491_v38  ;;  %v1874_v57 = vld [vmem:[%s2862_s3] sm:$0xff] }
 0x9fb   :  { %2347 = vmatprep.subr.mxu0 %v2491_v38 }
 0x9fd   :  { %2340 = vmatmul.mubr.msk.f32.vlgmr.msra.gmra.mxu0 %vm168_vm2, %v1492_v58 }
 0x9fe   :  { %2349 = vmatprep.mubr.msk.f32.mxu0 %vm2492_vm1, %v2491_v38 }
 0xa06   :  { %1595 = vrot.lane.b32.xlu1 %v2598_v43, %s2502_s24 }
 0xa7e   :  { %v1575_v59 = vpop.xlane.xlu1 %1574 }
 0xa7f   :  { %v1579_v61 = vsub.f32 %v1571_v54, %v1575_v59  ;;  %v1877_v54 = vld [vmem:[%s2862_s3 + $0x18] sm:$0xff] }
 0xa81   :  { %v1581_v62 = vmul.f32 1.442695, %v1579_v61 }
 0xa82   :  { %v1596_v60 = vpop.permute.xlu1 %1595 }
 0xa83   :  { %2343 = vmatpush3.msra.mxu1 %v1596_v60  ;;  %2448 = vpow2.f32 %v1581_v62 }
 0xa84   :  { %2352 = vmatprep.subr.mxu1 %v164_v22 }
 0xa90   :  { %v2449_v15 = vpop.eup %2448 }
 0xa91   :  { %v1585_v16 = vsel %vm168_vm2, %v2449_v15, 0.0 }
 0xab9   :  { %v2331_v2 = vpop.f32.mrf.mxu0 }
 0xaba   :  { %v1412_v9 = vadd.f32 %v2331_v2, %v993_v63 }
 0xabb   :  { %v1402_v10 = vpop.f32.mrf.mxu0 }
 0xabc   :  { %v1411_v38 = vadd.f32 %v1402_v10, %v988_v7 }
 0xabd   :  { %v1565_v11 = vpop.f32.mrf.mxu0 }
 0xabe   :  { %v1570_v12 = vmul.f32 0.35355338, %v1565_v11 }
 0xabf   :  { %v2341_v13 = vpop.f32.mrf.mxu0 }
 0xac0   :  { %v1572_v43 = vsel %vm2620_vm3, %v1570_v12, -1e+30 }
 0xac1   :  { %v1576_v14 = vsel %vm168_vm2, %v1572_v43, -inf }
 0xac2   :  { %1577 = vmax.xlane.f32.xlu0 %v1576_v14  ;;  %v2032_v14 = vld [vmem:[%s2863_s4 + $0x78] sm:$0xff] }
 0xac6   :  { %1586 = vadd.xlane.f32.xlu0 %v1585_v16  ;;  %v2030_v16 = vld [vmem:[%s2863_s4 + $0x68] sm:$0xff] }
 0xb4b   :  { %v1578_v3 = vpop.xlane.xlu0 %1577 }
 0xb4c   :  { %v1580_v17 = vsub.f32 %v1572_v43, %v1578_v3  ;;  %v2029_v3 = vld [vmem:[%s2863_s4 + $0x60] sm:$0xff] }
 0xb4e   :  { %v1583_v18 = vmul.f32 1.442695, %v1580_v17  ;;  %v2028_v17 = vld [vmem:[%s2863_s4 + $0x58] sm:$0xff] }
 0xb4f   :  { %v1587_v4 = vpop.xlane.xlu0 %1586 }
 0xb50   :  { %2450 = vpow2.f32 %v1583_v18  ;;  %v2027_v18 = vld [vmem:[%s2863_s4 + $0x50] sm:$0xff] }
 0xb51   :  { %2452 = vrcp.f32 %v1587_v4  ;;  %v2026_v4 = vld [vmem:[%s2863_s4 + $0x48] sm:$0xff] }
 0xb5d   :  { %v2451_v19 = vpop.eup %2450 }
 0xb5e   :  { %v2453_v20 = vpop.eup %2452  ;;  %v1588_v21 = vsel %vm168_vm2, %v2451_v19, 0.0 }
 0xb5f   :  { %1589 = vadd.xlane.f32.xlu0 %v1588_v21  ;;  %v1593_v49 = vmul.f32 %v2453_v20, %v2449_v15  ;;  %v2031_v15 = vld [vmem:[%s2863_s4 + $0x70] sm:$0xff]  ;;  %v2024_v20 = vld [vmem:[%s2863_s4 + $0x38] sm:$0xff] }
 0xb60   :  { %v2023_v21 = vld [vmem:[%s2863_s4 + $0x30] sm:$0xff] }
 0xb61   :  { %2345 = vmatmul.mubr.msk.f32.vlgmr.msra.gmra.mxu1 %vm168_vm2, %v1593_v49  ;;  %v2022_v49 = vld [vmem:[%s2863_s4 + $0x28] sm:$0xff] }
 0xb62   :  { %2353 = vmatpush3.msra.mxu1 %v164_v22  ;;  %v2021_v22 = vld [vmem:[%s2863_s4 + $0x20] sm:$0xff] }
 0xb63   :  { %2368 = vmatprep.subr.mxu1 %v2032_v14 }
 0xb75   :  { %1671 = vrot.lane.b32.xlu0 %v2602_v44, %s2502_s24 }
 0xbe8   :  { %v1590_v23 = vpop.xlane.xlu0 %1589 }
 0xbe9   :  { %2454 = vrcp.f32 %v1590_v23  ;;  %v2020_v23 = vld [vmem:[%s2863_s4 + $0x18] sm:$0xff] }
 0xbec   :  { %v1672_v24 = vpop.permute.xlu0 %1671 }
 0xbed   :  { %2348 = vmatpush3.msra.mxu0 %v1672_v24  ;;  %v2019_v24 = vld [vmem:[%s2863_s4 + $0x10] sm:$0xff] }
 0xbee   :  { %2357 = vmatprep.subr.mxu0 %v1877_v54 }
 0xbf6   :  { %v2455_v25 = vpop.eup %2454 }
 0xbf7   :  { %v1594_v26 = vmul.f32 %v2455_v25, %v2451_v19  ;;  %v2025_v19 = vld [vmem:[%s2863_s4 + $0x40] sm:$0xff]  ;;  %v2018_v25 = vld [vmem:[%s2863_s4 + $0x8] sm:$0xff] }
 0xbf9   :  { %2350 = vmatmul.mubr.msk.f32.vlgmr.msra.gmra.mxu0 %vm168_vm2, %v1594_v26  ;;  %v2017_v26 = vld [vmem:[%s2863_s4] sm:$0xff]  ;;  %s2504_s4 = smov [#allocation2]  }
 0xbfa   :  { %2358 = vmatpush3.msra.mxu0 %v1877_v54  ;;  %s2121_s10 = sshll.u32 %s2504_s4, 4  ;;  %s2122_s10 = int_to_ptr.vmem [resolvable:$true] %s2121_s10 }
 0xbfb   :  { %2359 = vmatprep.subr.mxu0 %v1876_v55  ;;  %s2468_s11 = scalar_lea.vmem %s2122_s10, 256  ;;  %p2473_p1 = scmp.lt.s32.totalorder %s2122_s10, %s2122_s10 }
 0xbfc   :  { %2360 = vmatpush3.msra.mxu0 %v1876_v55  ;;  %p2469_p0 = scmp.ne.s32.totalorder %s2122_s10, %s2468_s11  ;;  %p2474_p2 = scmp.lt.s32.totalorder %s2468_s11, %s2468_s11 }
 0xbfd   :  { %2361 = vmatprep.subr.mxu0 %v1875_v56 }
 0xbfe   :  { %2362 = vmatpush3.msra.mxu0 %v1875_v56  ;;  %p2475_p3 = por %p2474_p2, %p2473_p1 }
 0xbff   :  { %2363 = vmatprep.subr.mxu0 %v1874_v57 }
 0xc00   :  { %2364 = vmatpush3.msra.mxu0 %v1874_v57  ;;  %p2476_p4 = pnand %p2475_p3, %p2469_p0 }
 0xc21   :  { %v1667_v27 = vpop.f32.mrf.mxu1 }
 0xc22   :  { %2354 = vmatprep.mubr.msk.f32.mxu1 %vm168_vm2, %v1667_v27  ;;  %v1880_v27 = vsub.s32 3, %v2557_v5 }
 0xc23   :  { %v2346_v28 = vpop.f32.mrf.mxu1 }
 0xc24   :  { %v1881_v28 = vrot.slane %v2562_v6, %v1880_v27 }
 0xcb9   :  { %v1743_v29 = vpop.f32.mrf.mxu0 }
 0xcba   :  { %2355 = vmatmul.mubr.msk.f32.vlgmr.msra.gmra.mxu1 %vm168_vm2, %v1743_v29 }
 0xcbb   :  { %v2351_v44 = vpop.f32.mrf.mxu0  ;;  %2369 = vmatpush3.msra.mxu1 %v2032_v14 }
 0xcbc   :  { %2370 = vmatprep.subr.mxu1 %v2031_v15 }
 0xcbd   :  { %2371 = vmatpush3.msra.mxu1 %v2031_v15 }
 0xcbe   :  { %2372 = vmatprep.subr.mxu1 %v2030_v16 }
 0xcbf   :  { %2373 = vmatpush3.msra.mxu1 %v2030_v16 }
 0xcc0   :  { %2374 = vmatprep.subr.mxu1 %v2029_v3 }
 0xcc1   :  { %2375 = vmatpush3.msra.mxu1 %v2029_v3 }
 0xcc2   :  { %2376 = vmatprep.subr.mxu1 %v2028_v17 }
 0xcc3   :  { %2377 = vmatpush3.msra.mxu1 %v2028_v17 }
 0xcc4   :  { %2378 = vmatprep.subr.mxu1 %v2027_v18 }
 0xcc5   :  { %2379 = vmatpush3.msra.mxu1 %v2027_v18 }
 0xcc6   :  { %2380 = vmatprep.subr.mxu1 %v2026_v4 }
 0xcc7   :  { %2381 = vmatpush3.msra.mxu1 %v2026_v4 }
 0xcc8   :  { %2382 = vmatprep.subr.mxu1 %v2025_v19 }
 0xcc9   :  { %2383 = vmatpush3.msra.mxu1 %v2025_v19 }
 0xcca   :  { %2384 = vmatprep.subr.mxu1 %v2024_v20 }
 0xccb   :  { %2385 = vmatpush3.msra.mxu1 %v2024_v20 }
 0xccc   :  { %2386 = vmatprep.subr.mxu1 %v2023_v21 }
 0xccd   :  { %2387 = vmatpush3.msra.mxu1 %v2023_v21 }
 0xcce   :  { %2388 = vmatprep.subr.mxu1 %v2022_v49 }
 0xccf   :  { %2389 = vmatpush3.msra.mxu1 %v2022_v49 }
 0xcd0   :  { %2390 = vmatprep.subr.mxu1 %v2021_v22 }
 0xcd1   :  { %2391 = vmatpush3.msra.mxu1 %v2021_v22 }
 0xcd2   :  { %2392 = vmatprep.subr.mxu1 %v2020_v23 }
 0xcd3   :  { %2393 = vmatpush3.msra.mxu1 %v2020_v23 }
 0xcd4   :  { %2394 = vmatprep.subr.mxu1 %v2019_v24 }
 0xcd5   :  { %2395 = vmatpush3.msra.mxu1 %v2019_v24 }
 0xcd6   :  { %2396 = vmatprep.subr.mxu1 %v2018_v25 }
 0xcd7   :  { %2397 = vmatpush3.msra.mxu1 %v2018_v25 }
 0xcd8   :  { %2398 = vmatprep.subr.mxu1 %v2017_v26 }
 0xcd9   :  { %2399 = vmatpush3.msra.mxu1 %v2017_v26 }
 0xd7a   :  { %v2356_v31 = vpop.f32.mrf.mxu1 }
 0xd7b   :  { %v1829_v32 = vadd.f32 %v2356_v31, %v1412_v9 }
 0xd7c   :  { %v1819_v34 = vpop.f32.mrf.mxu1 }
 0xd7d   :  { %v1831_v35 = vadd.f32 %v1829_v32, %v2550_v1  ;;  %v1828_v36 = vadd.f32 %v1819_v34, %v1411_v38 }
 0xd7f   :  { %v2771_v37 = vadd.f32 %v1835_v33, %v1831_v35  ;;  %v1830_v39 = vadd.f32 %v1828_v36, %v2545_v0 }
 0xd81   :  { %v2774_v40 = vadd.f32 %v1835_v33, %v1830_v39  ;;  %v1841_v41 = vsel %vm27_vm0, %v2771_v37, 0.0 }
 0xd82   :  { %1842 = vadd.xlane.f32.xlu0 %v1841_v41 }
 0xd83   :  { %v1838_v42 = vsel %vm27_vm0, %v2774_v40, 0.0 }
 0xd84   :  { %1839 = vadd.xlane.f32.xlu1 %v1838_v42 }
 0xe0b   :  { %v1843_v45 = vpop.xlane.xlu0 %1842 }
 0xe0c   :  { %v1845_v46 = vmul.f32 0.03125, %v1843_v45 }
 0xe0d   :  { %v1840_v47 = vpop.xlane.xlu1 %1839 }
 0xe0e   :  { %v1847_v1 = vsub.f32 %v2771_v37, %v1845_v46  ;;  %v1844_v48 = vmul.f32 0.03125, %v1840_v47 }
 0xe10   :  { %v1846_v50 = vsub.f32 %v2774_v40, %v1844_v48  ;;  %v1849_v51 = vmul.f32 %v1847_v1, %v1847_v1 }
 0xe12   :  { %v1853_v0 = vsel %vm27_vm0, %v1849_v51, 0.0  ;;  %v1848_v52 = vmul.f32 %v1846_v50, %v1846_v50 }
 0xe13   :  { %1854 = vadd.xlane.f32.xlu0 %v1853_v0 }
 0xe14   :  { %v1850_v53 = vsel %vm27_vm0, %v1848_v52, 0.0 }
 0xe15   :  { %1851 = vadd.xlane.f32.xlu1 %v1850_v53 }
 0xe26   :  { %1864 = vrot.lane.b32.xlu1 %v2566_v8, %s2493_s1 }
 0xe29   :  { %1869 = vrot.lane.b32.xlu0 %v2566_v8, %s2503_s27 }
 0xe2a   :  { %2034 = vrot.lane.b32.xlu1 %v1835_v33, %s2490_s0 }
 0xe9c   :  { %v1855_v8 = vpop.xlane.xlu0 %1854 }
 0xe9d   :  { %v1857_v58 = vmul.f32 0.03125, %v1855_v8 }
 0xe9e   :  { %v1852_v59 = vpop.xlane.xlu1 %1851 }
 0xe9f   :  { %v1859_v60 = vadd.f32 1e-05, %v1857_v58  ;;  %v1856_v61 = vmul.f32 0.03125, %v1852_v59 }
 0xea0   :  { %v1870_v12 = vpop.permute.xlu0 %1869 }
 0xea1   :  { %2456 = vrsqrt.f32 %v1859_v60  ;;  %v1858_v62 = vadd.f32 1e-05, %v1856_v61 }
 0xea2   :  { %v1865_v7 = vpop.permute.xlu1 %1864 }
 0xea3   :  { %2458 = vrsqrt.f32 %v1858_v62 }
 0xea6   :  { %v2035_v49 = vpop.permute.xlu1 %2034 }
 0xeae   :  { %v2457_v63 = vpop.eup %2456 }
 0xeaf   :  { %v1863_v2 = vmul.f32 %v2457_v63, %v1847_v1 }
 0xeb0   :  { %v2459_v9 = vpop.eup %2458 }
 0xeb1   :  { %v1862_v10 = vmul.f32 %v2459_v9, %v1846_v50  ;;  %v1868_v38 = vmul.f32 %v1865_v7, %v1863_v2 }
 0xeb3   :  { %v1867_v11 = vmul.f32 %v1865_v7, %v1862_v10  ;;  %v1873_v43 = vadd.f32 %v1870_v12, %v1868_v38 }
 0xeb5   :  { %v1872_v13 = vadd.f32 %v1870_v12, %v1867_v11 }
 0xeb7   :  { %2365 = vmatprep.mubr.msk.f32.mxu0 %vm27_vm0, %v1872_v13 }
 0xeb8   :  { %2366 = vmatmul.mubr.msk.f32.vlgmr.msra.gmra.mxu0 %vm27_vm0, %v1873_v43 }
 0xf78   :  { %v2367_v29 = vpop.f32.mrf.mxu0 }
 0xf79   :  { %v1960_v44 = vadd.f32 %v2367_v29, %v1881_v28 }
 0xf7a   :  { %v1954_v30 = vpop.f32.mrf.mxu0 }
 0xf7b   :  { %v1966_v31 = vmul.f32 0.70710677, %v1960_v44  ;;  %v1955_v32 = vadd.f32 %v1954_v30, %v1881_v28  ;;  %v1964_v19 = vmul.f32 0.5, %v1960_v44 }
 0xf7d   :  { %v1968_v33 = vand.u32 2147483647, %v1966_v31  ;;  %v1965_v34 = vmul.f32 0.70710677, %v1955_v32  ;;  %vm2008_vm4 = vcmp.ge.f32.partialorder %v1966_v31, 0.0  ;;  %v1963_v18 = vmul.f32 0.5, %v1955_v32 }
 0xf7f   :  { %v1970_v35 = vmul.f32 0.3275911, %v1968_v33  ;;  %v1967_v36 = vand.u32 2147483647, %v1965_v34  ;;  %v1996_v45 = vsub.f32 0.0, %v1968_v33  ;;  %vm2007_vm5 = vcmp.ge.f32.partialorder %v1965_v34, 0.0 }
 0xf81   :  { %v1972_v39 = vadd.f32 1.0, %v1970_v35  ;;  %v1969_v41 = vmul.f32 0.3275911, %v1967_v36  ;;  %v1995_v46 = vsub.f32 0.0, %v1967_v36  ;;  %v1998_v47 = vmul.f32 %v1996_v45, %v1968_v33 }
 0xf83   :  { %2460 = vrcp.f32 %v1972_v39  ;;  %v1971_v42 = vadd.f32 1.0, %v1969_v41  ;;  %v1997_v1 = vmul.f32 %v1995_v46, %v1967_v36  ;;  %v2001_v48 = vmul.f32 1.442695, %v1998_v47 }
 0xf85   :  { %2462 = vrcp.f32 %v1971_v42  ;;  %v1999_v0 = vmul.f32 1.442695, %v1997_v1 }
 0xf86   :  { %2464 = vpow2.f32 %v2001_v48 }
 0xf87   :  { %2466 = vpow2.f32 %v1999_v0 }
 0xf90   :  { %v2461_v5 = vpop.eup %2460 }
 0xf91   :  { %v1978_v6 = vmul.f32 1.0614054, %v2461_v5 }
 0xf92   :  { %v2463_v50 = vpop.eup %2462 }
 0xf93   :  { %v2169_v51 = vadd.f32 -1.4531521, %v1978_v6  ;;  %v1977_v52 = vmul.f32 1.0614054, %v2463_v50  ;;  %v2465_v7 = vpop.eup %2464 }
 0xf94   :  { %v2467_v11 = vpop.eup %2466 }
 0xf95   :  { %v1982_v53 = vmul.f32 %v2461_v5, %v2169_v51  ;;  %v2168_v54 = vadd.f32 -1.4531521, %v1977_v52 }
 0xf97   :  { %v1984_v55 = vadd.f32 1.4214138, %v1982_v53  ;;  %v1981_v56 = vmul.f32 %v2463_v50, %v2168_v54 }
 0xf99   :  { %v1986_v57 = vmul.f32 %v2461_v5, %v1984_v55  ;;  %v1983_v8 = vadd.f32 1.4214138, %v1981_v56 }
 0xf9b   :  { %v2171_v58 = vadd.f32 -0.28449672, %v1986_v57  ;;  %v1985_v59 = vmul.f32 %v2463_v50, %v1983_v8 }
 0xf9d   :  { %v1990_v60 = vmul.f32 %v2461_v5, %v2171_v58  ;;  %v2170_v61 = vadd.f32 -0.28449672, %v1985_v59 }
 0xf9f   :  { %v1992_v62 = vadd.f32 0.2548296, %v1990_v60  ;;  %v1989_v63 = vmul.f32 %v2463_v50, %v2170_v61 }
 0xfa1   :  { %v1994_v2 = vmul.f32 %v2461_v5, %v1992_v62  ;;  %v1991_v9 = vadd.f32 0.2548296, %v1989_v63 }
 0xfa3   :  { %v2004_v10 = vmul.f32 %v2465_v7, %v1994_v2  ;;  %v1993_v38 = vmul.f32 %v2463_v50, %v1991_v9 }
 0xfa5   :  { %v2006_v12 = vsub.f32 1.0, %v2004_v10  ;;  %v2003_v13 = vmul.f32 %v2467_v11, %v1993_v38 }
 0xfa7   :  { %v2010_v43 = vsub.f32 0.0, %v2006_v12  ;;  %v2005_v14 = vsub.f32 1.0, %v2003_v13 }
 0xfa9   :  { %v2012_v15 = vsel %vm2008_vm4, %v2006_v12, %v2010_v43  ;;  %v2009_v16 = vsub.f32 0.0, %v2005_v14 }
 0xfaa   :  { %v2014_v3 = vadd.f32 1.0, %v2012_v15 }
 0xfab   :  { %v2011_v17 = vsel %vm2007_vm5, %v2005_v14, %v2009_v16 }
 0xfac   :  { %v2013_v4 = vadd.f32 1.0, %v2011_v17  ;;  %v2016_v21 = vmul.f32 %v2014_v3, %v1964_v19 }
 0xfae   :  { %v2015_v20 = vmul.f32 %v2013_v4, %v1963_v18 }
 0xfb0   :  { %2400 = vmatprep.mubr.f32.mxu1 %v2015_v20 }
 0xfb1   :  { %2401 = vmatmul.mubr.f32.vlgmr.msra.gmra.mxu1 %v2016_v21 }
0x1071   :  { %v2402_v22 = vpop.f32.mrf.mxu1 }
0x1072   :  { %v2109_v23 = vadd.f32 %v2402_v22, %v2035_v49 }
0x1073   :  { %v2103_v24 = vpop.f32.mrf.mxu1 }
0x1074   :  { %v2113_v25 = vadd.f32 %v2109_v23, %v2771_v37  ;;  %v2104_v26 = vadd.f32 %v2103_v24, %v2035_v49 }
0x1076   :  { %2115 = vst.msk [vmem:[#allocation2 + $0x8] sm:$0xff] %vm27_vm0, %v2113_v25  ;;  %v2112_v27 = vadd.f32 %v2104_v26, %v2774_v40 }
0x1078   :  { %2114 = vst.msk [vmem:[#allocation2] sm:$0xff] %vm27_vm0, %v2112_v27 }
0x1079   :  { %2479 = shalt.err (!%p2476_p4)
}
0x107a   :  { %s2505_s12 = smov 128   ;;  %s2506_s13 = smov 8  }
0x107b   :  { %2127 = dma.vmem_to_hbm [thread:$0]  %s2122_s10, 256, %s2865_s6, [#allocation3], %s2505_s12, %s2505_s12, %s2506_s13  }
0x107c   :  { %2488 = dma.done.wait [#allocation3], 256  }
0x107d   :  { %2489 = vsyncadd [#allocation3], 4294967040 }
0x107e   :  { %2131 = vsyncpa [#allocation3], 1 }

</bundles_post_ra>
